<compile_context>
chip_gen: v6e
topology: v6e:2x2x1
jax: 0.10.0
libtpu: 0.0.40
codegen_flags: <defaults>
</compile_context>

<pallas_src>
import jax
import jax.numpy as jnp
import numpy as np
from jax.experimental import pallas as pl
from jax.experimental.pallas import tpu as pltpu

MAX_SEQ_LEN = 20  # fixed by torch.ops.fbgemm.jagged_2d_to_dense(max_sequence_length=20)


def _emb_lookup_kernel(ids_ref, table_ref, out_ref):
    # Per (feature, sample) block:
    #   ids_ref   [L, 1] int32  -- padded positions hold -1 (outside [0, V))
    #   table_ref [V, D] f32    -- this feature's EmbeddingCollection table
    #   out_ref   [L, D] f32    -- padded, looked-up embeddings for this sample
    ids = ids_ref[...]
    table = table_ref[...]
    L = ids.shape[0]
    V = table.shape[0]
    # One-hot gather on the MXU: out[l, :] = table[ids[l], :]; ids == -1 (jagged
    # padding) produces an all-zero one-hot row, i.e. zero-padded output rows.
    iota_v = jax.lax.broadcasted_iota(jnp.int32, (L, V), 1)
    onehot = (iota_v == ids).astype(table.dtype)                       # [L, V]
    emb = jnp.dot(onehot, table, preferred_element_type=jnp.float32)   # [L, D]
    out_ref[...] = emb.astype(out_ref.dtype)


def sequence_sparse_arch_forward(tables, dense_ids, lengths):
    """
    tables:    [F, V, D] f32  -- EmbeddingCollection table weights (all tables share D)
    dense_ids: [F, B, L]  i32 -- densified KeyedJaggedTensor ids (L == MAX_SEQ_LEN)
    lengths:   [F, B]     i32 -- jagged lengths (truncated to L, as fbgemm does)
    returns:   [B, F*L*D] f32
    """
    F, V, D = tables.shape
    _, B, L = dense_ids.shape

    # Glue: encode the jagged validity directly in the ids. Positions >= length get -1,
    # which yields an all-zero one-hot row in the kernel (== jagged_2d_to_dense zero
    # padding). This replaces the separate f32 mask stream of the previous version.
    valid = (
        jnp.arange(L, dtype=jnp.int32)[None, None, :]
        < jnp.minimum(lengths, L)[:, :, None]
    )
    ids = jnp.where(valid, dense_ids, jnp.int32(-1)).astype(jnp.int32)
    ids = ids.reshape(F, B, L, 1)  # trailing (L, 1) block == full trailing dims

    out = pl.pallas_call(
        _emb_lookup_kernel,
        out_shape=jax.ShapeDtypeStruct((B, F, L, D), jnp.float32),
        grid=(F, B),  # B innermost: table block index constant across B -> fetched once per feature
        in_specs=[
            # ids: one sample of one feature per step
            pl.BlockSpec((None, None, L, 1), lambda f, b: (f, b, 0, 0)),
            # table: whole table of the current feature (reused across the inner B axis)
            pl.BlockSpec((None, V, D), lambda f, b: (f, 0, 0)),
        ],
        # Output block lands directly at its final position in [B, F, L, D]; the final
        # torch `cat(..., dim=1)` layout is then a free trailing-dim reshape.
        out_specs=pl.BlockSpec((None, None, L, D), lambda f, b: (b, f, 0, 0)),
        compiler_params=pltpu.CompilerParams(
            dimension_semantics=("parallel", "parallel"),
        ),
    )(ids, tables)

    # Free merge of trailing dims (no transpose, no extra HBM pass).
    return out.reshape(B, F * L * D)


if __name__ == "__main__":
    key = jax.random.PRNGKey(0)
    F, V, D = 2, 16, 8   # num features/tables, vocab per table, embedding_dim
    B = 2                # batch size

    k_tab, k_len, k_ids = jax.random.split(key, 3)
    # deterministic synthetic EmbeddingCollection weights
    tables = jax.random.normal(k_tab, (F, V, D), dtype=jnp.float32)
    # synthetic KeyedJaggedTensor: jagged lengths + ids, densified to MAX_SEQ_LEN
    lengths = jax.random.randint(k_len, (F, B), 0, MAX_SEQ_LEN + 1, dtype=jnp.int32)
    dense_ids = jax.random.randint(k_ids, (F, B, MAX_SEQ_LEN), 0, V, dtype=jnp.int32)

    out = sequence_sparse_arch_forward(tables, dense_ids, lengths)
    out = jax.block_until_ready(out)

    # plain-JAX reference for correctness (lookup, zero jagged padding, cat per feature)
    valid = (
        jnp.arange(MAX_SEQ_LEN, dtype=jnp.int32)[None, None, :]
        < jnp.minimum(lengths, MAX_SEQ_LEN)[:, :, None]
    ).astype(jnp.float32)
    ref = jax.vmap(lambda t, i: t[i])(tables, dense_ids.reshape(F, -1))   # [F, B*L, D]
    ref = ref.reshape(F, B, MAX_SEQ_LEN, D) * valid[..., None]
    ref = ref.transpose(1, 0, 2, 3).reshape(B, F * MAX_SEQ_LEN * D)

    assert out.shape == (B, F * MAX_SEQ_LEN * D)
    np.testing.assert_allclose(np.asarray(out), np.asarray(ref), rtol=1e-6, atol=1e-6)
    print("KERNEL_OK")
</pallas_src>

<mosaic_0001>
module attributes {stable_mosaic.version = 11 : i64} {
  func.func @_emb_lookup_kernel(%arg0: i32, %arg1: i32, %arg2: memref<1x1x20x1xi32, #tpu.memory_space<vmem>>, %arg3: memref<1x16x8xf32, #tpu.memory_space<vmem>>, %arg4: memref<1x1x20x8xf32, #tpu.memory_space<vmem>>) attributes {dimension_semantics = [#tpu.dimension_semantics<parallel>, #tpu.dimension_semantics<parallel>], iteration_bounds = array<i64: 2, 2>, scalar_prefetch = 0 : i64, scratch_operands = 0 : i64, tpu.core_type = #tpu.core_type<tc>, window_params = [{transform_indices = @transform_0, window_bounds = array<i64: 1, 1, 20, 1>}, {transform_indices = @transform_1, window_bounds = array<i64: 1, 16, 8>}, {transform_indices = @transform_2, window_bounds = array<i64: 1, 1, 20, 8>}]} {
    %c0 = arith.constant 0 : index
    %c0_0 = arith.constant 0 : index
    %c0_1 = arith.constant 0 : index
    %c0_2 = arith.constant 0 : index
    %0 = vector.load %arg2[%c0, %c0_0, %c0_1, %c0_2] : memref<1x1x20x1xi32, #tpu.memory_space<vmem>>, vector<1x1x20x1xi32>
    %1 = vector.shape_cast %0 : vector<1x1x20x1xi32> to vector<20x1xi32>
    %c0_3 = arith.constant 0 : index
    %c0_4 = arith.constant 0 : index
    %c0_5 = arith.constant 0 : index
    %2 = vector.load %arg3[%c0_3, %c0_4, %c0_5] : memref<1x16x8xf32, #tpu.memory_space<vmem>>, vector<1x16x8xf32>
    %3 = vector.shape_cast %2 : vector<1x16x8xf32> to vector<16x8xf32>
    %4 = tpu.iota {dimensions = array<i32: 1>} : vector<20x16xi32>
    %5 = vector.broadcast %1 : vector<20x1xi32> to vector<20x16xi32>
    %6 = arith.cmpi eq, %4, %5 : vector<20x16xi32>
    %7 = arith.extui %6 : vector<20x16xi1> to vector<20x16xi32>
    %8 = arith.sitofp %7 : vector<20x16xi32> to vector<20x16xf32>
    %cst = arith.constant dense<0.000000e+00> : vector<20x8xf32>
    %9 = tpu.matmul %8, %3, %cst {dimension_numbers = #tpu.dot_dimension_numbers<[1], [0], [0], [1], [0, 0, 1, 1], [], []>} : vector<20x16xf32>, vector<16x8xf32>, vector<20x8xf32> -> vector<20x8xf32>
    %c0_6 = arith.constant 0 : index
    %c0_7 = arith.constant 0 : index
    %c0_8 = arith.constant 0 : index
    %c0_9 = arith.constant 0 : index
    %10 = vector.load %arg4[%c0_6, %c0_7, %c0_8, %c0_9] : memref<1x1x20x8xf32, #tpu.memory_space<vmem>>, vector<1x1x20x8xf32>
    %11 = vector.shape_cast %10 : vector<1x1x20x8xf32> to vector<20x8xf32>
    %12 = vector.shape_cast %9 : vector<20x8xf32> to vector<1x1x20x8xf32>
    tpu.vector_store %arg4[%c0_6, %c0_7, %c0_8, %c0_9], %12 {strides = array<i32>} : memref<1x1x20x8xf32, #tpu.memory_space<vmem>>, vector<1x1x20x8xf32>,
    return
  }
  func.func @transform_0(%arg0: i32, %arg1: i32) -> (i32, i32, i32, i32) {
    %c0_i32 = arith.constant 0 : i32
    %c0_i32_0 = arith.constant 0 : i32
    %c0_i32_1 = arith.constant 0 : i32
    return %arg0, %arg1, %c0_i32, %c0_i32_0 : i32, i32, i32, i32
  }
  func.func @transform_1(%arg0: i32, %arg1: i32) -> (i32, i32, i32) {
    %c0_i32 = arith.constant 0 : i32
    %c0_i32_0 = arith.constant 0 : i32
    %c0_i32_1 = arith.constant 0 : i32
    return %arg0, %c0_i32, %c0_i32_0 : i32, i32, i32
  }
  func.func @transform_2(%arg0: i32, %arg1: i32) -> (i32, i32, i32, i32) {
    %c0_i32 = arith.constant 0 : i32
    %c0_i32_0 = arith.constant 0 : i32
    %c0_i32_1 = arith.constant 0 : i32
    return %arg1, %arg0, %c0_i32, %c0_i32_0 : i32, i32, i32, i32
  }
}

</mosaic_0001>

<bundles_post_ra>
// kernel: tpu_custom_call.1
= control target key start
LH: loop header
LB: loop body
LE: loop exit
PB: predicated region body
PF: predicated region fallthrough
CT: control target
= control target key end

     0   :  { %s574_s9 = smov 0   ;;  %s576_s10 = smov 0   ;;  %s636_s0 = inlined_call_operand.vmem [shape: s32[2,2,20,1], index: 0, kind: input, shape index: {}]   ;;  %s637_s1 = inlined_call_operand.vmem [shape: f32[2,16,8], index: 1, kind: input, shape index: {}]   ;;  %s638_s2 = inlined_call_operand.vmem [shape: f32[2,2,20,8], index: 2, kind: output, shape index: {}]  }
   0x1   :  { %s578_s11 = smov 0   ;;  %s580_s12 = smov 0  }
   0x2   :  { %s582_s13 = smov 0  }
   0x3 LB: > { %s21_s14 = sadd.s32 1, %s546_s11  ;;  %s24_s15 = sadd.s32 1, %s550_s12  ;;  %s554_s13 = sphi %s582_s13, %s12_s13   ;;  %s550_s12 = sphi %s580_s12, %s642_s12   ;;  %s546_s11 = sphi %s578_s11, %s641_s11   ;;  %s542_s10 = sphi %s576_s10, %s640_s10   ;;  %s538_s9 = sphi %s574_s9, %s639_s9  }
   0x4   : > { %p22_p0 = scmp.ge.s32.totalorder %s21_s14, 2  ;;  %p431_p1 = scmp.ge.s32.totalorder %s554_s13, 1 }
   0x5   : > { %p142_p2 = scmp.lt.s32.totalorder %s554_s13, 5 }
   0x6   : > { %s644_s14 = smov (%p22_p0, %s21_s14), 0  ;;  %s646_s15 = smov (!%p22_p0, %s24_s15), %s550_s12 }
   0x7   : > { %p143_p3 = pnand %p431_p1, %p142_p2  ;;  %p26_p4 = scmp.ge.s32.totalorder %s646_s15, 2 }
   0x8   : > { %p177_p5 = scmp.lt.s32.totalorder (!%p143_p3), %s542_s10, 1  ;;  %p179_p6 = scmp.lt.s32.totalorder (!%p143_p3), %s538_s9, 1 }
   0x9   : > { %s648_s15 = smov (%p26_p4, %s646_s15), 0  ;;  %146 = sbr.rel (%p143_p3) target bundleno = 347 (0x15b), region = 28 }
   0xe   : > { %v556_v0 = vmov 0   ;;  %s650_s10 = smov (!%p177_p5, %s542_s10), 1  ;;  %v557_v1 = vmov 0.0   ;;  %s652_s9 = smov (!%p179_p6, %s538_s9), 1  ;;  %vm558_vm0 = vmmov 0   ;;  %v205_v7 = vlaneseq }
   0xf   : > { %514 = vset.pattern.permute.xlu0 %v556_v0  ;;  %515 = vset.pattern.permute.xlu1 %v556_v0  ;;  %s468_s16 = smul.u32 6, %s650_s10  ;;  %s444_s17 = sshll.u32 %s650_s10, 4  ;;  %vm225_vm1 = vcmask 130048   ;;  %vm315_vm5 = vcmask 64512   ;;  %vm318_vm6 = vcmask 60416  }
  0x10   : > { %463 = vmatprep.subr.mxu1 %v557_v1  ;;  %450 = vmatprep.subr.mxu0 %v557_v1  ;;  %s467_s18 = smul.u32 3, %s652_s9  ;;  %s190_s21 = scalar_lea.vmem %s637_s1, %s444_s17  ;;  %v206_v8 = vand.u32 127, %v205_v7 }
  0x11   : > { %v204_v2 = vld [vmem:[%s190_s21 + $0x8] sm:$0xff]  ;;  %v203_v3 = vld [vmem:[%s190_s21] sm:$0xff]  ;;  %457 = vmatprep.mubr.msk.f32.mxu1 %vm558_vm0, %v557_v1  ;;  %454 = vmatprep.mubr.msk.f32.mxu0 %vm558_vm0, %v557_v1  ;;  %s469_s27 = smul.u32 3, %s650_s10 }
  0x12   : > { %s183_s22 = sadd.s32 %s468_s16, %s467_s18  ;;  %465 = vmatpush3.msra.mxu1 %v204_v2  ;;  %451 = vmatpush3.msra.mxu0 %v204_v2  ;;  %s470_s28 = smul.u32 6, %s652_s9 }
  0x13   : > { %s432_s23 = sshll.u32 %s183_s22, 3  ;;  %464 = vmatprep.subr.mxu1 %v557_v1  ;;  %452 = vmatprep.subr.mxu0 %v557_v1 }
  0x14   : > { %s185_s26 = scalar_lea.vmem %s636_s0, %s432_s23  ;;  %466 = vmatpush3.msra.mxu1 %v203_v3  ;;  %453 = vmatpush3.msra.mxu0 %v203_v3  ;;  %s197_s29 = sadd.s32 %s470_s28, %s469_s27 }
  0x15   : > { %v201_v4 = vld [vmem:[%s185_s26 + $0x8] sm:$0xff]  ;;  %v202_v5 = vld [vmem:[%s185_s26 + $0x10] sm:$0xf]  ;;  %v200_v6 = vld [vmem:[%s185_s26] sm:$0xff]  ;;  %s435_s30 = sshll.u32 %s197_s29, 3 }
  0x16   : > { %211 = vperm.xlu0 %514, %v201_v4   ;;  %214 = vperm.xlu1 %515, %v202_v5   ;;  %s199_s5 = scalar_lea.vmem %s638_s2, %s435_s30 }
  0x1a   : > { %208 = vperm.xlu0 %514, %v200_v6  }
  0x91   : > { %v212_v9 = vpop.permute.xlu0 %211  ;;  %v215_v10 = vpop.permute.xlu1 %214 }
  0x92   : > { %vm217_vm2 = vcmp.eq.s32.totalorder %v206_v8, %v212_v9  ;;  %vm218_vm3 = vcmp.eq.s32.totalorder %v206_v8, %v215_v10 }
  0x93   : > { %v437_v11 = vsel %vm217_vm2, 1.0, %v557_v1  ;;  %v438_v12 = vsel %vm218_vm3, 1.0, %v557_v1 }
  0x94   : > { %458 = vmatmul.mubr.msk.f32.vlgmr.msra.gmra.mxu1 %vm225_vm1, %v437_v11 }
  0x95   : > { %v209_v13 = vpop.permute.xlu0 %208  ;;  %460 = vmatprep.mubr.msk.f32.mxu1 %vm558_vm0, %v557_v1 }
  0x96   : > { %vm216_vm4 = vcmp.eq.s32.totalorder %v206_v8, %v209_v13 }
  0x97   : > { %v436_v14 = vsel %vm216_vm4, 1.0, %v557_v1 }
  0x98   : > { %455 = vmatmul.mubr.msk.f32.vlgmr.msra.gmra.mxu0 %vm225_vm1, %v436_v14  ;;  %461 = vmatmul.mubr.msk.f32.gmra.mxu1 %vm225_vm1, %v438_v12 }
 0x154   : > { %v306_v15 = vpop.f32.mrf.mxu1 }
 0x155   : > { %317 = vst.msk [vmem:[%s199_s5 + $0x8] sm:$0xff] %vm315_vm5, %v306_v15 }
 0x156   : > { %v459_v16 = vpop.f32.mrf.mxu1 }
 0x158   : > { %v301_v17 = vpop.f32.mrf.mxu0  ;;  %v311_v18 = vpop.f32.mrf.mxu1 }
 0x159   : > { %316 = vst.msk [vmem:[%s199_s5] sm:$0xff] %vm315_vm5, %v301_v17 }
 0x15a   : > { %319 = vst.msk [vmem:[%s199_s5 + $0x10] sm:$0xf] %vm318_vm6, %v311_v18  ;;  %v456_v19 = vpop.f32.mrf.mxu0  ;;  %v462_v20 = vpop.f32.mrf.mxu1 }
 0x15b PF: > { %s12_s13 = sadd.s32 1, %s554_s13   ;;  %s639_s9 = smov %s546_s11 }
 0x15c   : > { %p9_p7 = scmp.ge.s32.totalorder %s12_s13, 6   ;;  %s640_s10 = smov %s550_s12 }
 0x15d   : > { %s641_s11 = smov %s644_s14  ;;  %s642_s12 = smov %s648_s15 }
 0x15e   :  { %11 = sbr.rel (!%p9_p7) target bundleno = 3 (0x3), region = 61 }

</bundles_post_ra>
